<compile_context>
chip_gen: v7x
topology: tpu7x:2x2x1
jax: 0.10.0
libtpu: 0.0.40
codegen_flags: <defaults>
</compile_context>

<pallas_src>
import functools

import jax
import jax.numpy as jnp
from jax import lax
from jax.experimental import pallas as pl
from jax.experimental.pallas import tpu as pltpu

LN_EPS = 1e-5       # PyTorch nn.LayerNorm default
SUBLANE = 8
MAX_TP = 1024       # row-tile size; sweep {1024, 2048, 4096} on real shapes


def _round_up(n, m):
    return (n + m - 1) // m * m


def _patch_embed_kernel(x_ref, w_ref, p_ref, o_ref):
    # x_ref: (TP, K)  im2col patch tile (true K, no HBM padding)
    # w_ref: (K, E)   flattened conv weight, VMEM resident across the grid
    # p_ref: (3, E)   f32: row 0 = LN gamma, row 1 = LN beta, row 2 = conv bias
    # o_ref: (TP, E)  output tile (true E)
    y = jnp.dot(x_ref[...], w_ref[...],
                preferred_element_type=jnp.float32)          # (TP, E) f32
    y = y + p_ref[2:3, :]                                    # conv bias

    # LayerNorm over embed_dim (f32 statistics).
    inv_e = 1.0 / y.shape[-1]
    mean = jnp.sum(y, axis=-1, keepdims=True) * inv_e
    centered = y - mean
    var = jnp.sum(centered * centered, axis=-1, keepdims=True) * inv_e
    y_hat = centered * lax.rsqrt(var + LN_EPS)

    out = y_hat * p_ref[0:1, :] + p_ref[1:2, :]
    o_ref[...] = out.astype(o_ref.dtype)


def _im2col(x, kh, kw, stride, ph, pw):
    """x: (B, C, H, W) -> patches (B*P, C*kh*kw) with feature order (C, kh, kw)."""
    B, C, H, W = x.shape
    H_out = (H + 2 * ph - kh) // stride + 1
    W_out = (W + 2 * pw - kw) // stride + 1
    # Pad + NHWC transpose: one pass over the *small* image (not the ~3x
    # expanded patches array).
    xp = jnp.pad(x, ((0, 0), (0, 0), (ph, ph), (pw, pw)))
    xp = jnp.transpose(xp, (0, 2, 3, 1))                     # (B, Hp, Wp, C)
    # kh*kw strided slices (no gather); stack filter positions as the fastest
    # feature axis so the flattened feature order is (C, kh, kw) — matching
    # the flattened PyTorch conv weight (E, C, kh, kw).
    cols = []
    for dy in range(kh):
        for dx in range(kw):
            cols.append(lax.slice(
                xp,
                (0, dy, dx, 0),
                (B, dy + (H_out - 1) * stride + 1,
                 dx + (W_out - 1) * stride + 1, C),
                (1, stride, stride, 1)))                     # (B, H_out, W_out, C)
    patches = jnp.stack(cols, axis=-1)                       # (B, H_out, W_out, C, kh*kw)
    patches = patches.reshape(B * H_out * W_out, C * kh * kw)
    return patches, H_out, W_out


@functools.partial(jax.jit, static_argnames=("patch_size", "stride"))
def patch_embed(x, conv_w, conv_b, ln_g, ln_b, *, patch_size, stride):
    """x: (B, C, H, W) NCHW. conv_w: (E, C, kh, kw). Returns ((B, P, E), H_out, W_out)."""
    kh = kw = patch_size
    ph, pw = kh // 2, kw // 2
    B, C, H, W = x.shape
    E = conv_w.shape[0]
    K = C * kh * kw

    patches, H_out, W_out = _im2col(x, kh, kw, stride, ph, pw)   # (R, K)
    P = H_out * W_out
    R = B * P

    # Weight: (E, C, kh, kw) -> (K, E); LN params + conv bias in one f32 block.
    w = conv_w.reshape(E, K).T.astype(x.dtype)                   # (K, E)
    params = jnp.stack([ln_g, ln_b, conv_b]).astype(jnp.float32)  # (3, E)

    # Row tiling over the flattened (B*P) axis; ragged tail handled by cdiv
    # grid (row-wise LN: garbage tail rows never contaminate valid rows and
    # their out-of-range writes are dropped).
    TP = min(MAX_TP, _round_up(R, SUBLANE))
    grid = (pl.cdiv(R, TP),)

    out = pl.pallas_call(
        _patch_embed_kernel,
        out_shape=jax.ShapeDtypeStruct((R, E), x.dtype),
        grid_spec=pltpu.PrefetchScalarGridSpec(
            num_scalar_prefetch=0,
            grid=grid,
            in_specs=[
                pl.BlockSpec((TP, K), lambda r: (r, 0)),   # patches tile
                pl.BlockSpec((K, E), lambda r: (0, 0)),    # weight, VMEM resident
                pl.BlockSpec((3, E), lambda r: (0, 0)),    # gamma/beta/bias
            ],
            out_specs=pl.BlockSpec((TP, E), lambda r: (r, 0)),
        ),
        compiler_params=pltpu.CompilerParams(
            dimension_semantics=("parallel",)),
    )(patches, w, params)

    return out.reshape(B, P, E), H_out, W_out


def _reference(x, conv_w, conv_b, ln_g, ln_b, patch_size, stride):
    ph = pw = patch_size // 2
    y = lax.conv_general_dilated(
        x, conv_w, window_strides=(stride, stride),
        padding=((ph, ph), (pw, pw)),
        dimension_numbers=("NCHW", "OIHW", "NCHW"))
    y = y + conv_b[None, :, None, None]
    B, E, H, W = y.shape
    y = y.reshape(B, E, H * W).transpose(0, 2, 1)   # (B, P, E)
    mean = jnp.mean(y, axis=-1, keepdims=True)
    var = jnp.mean(jnp.square(y - mean), axis=-1, keepdims=True)
    y = (y - mean) / jnp.sqrt(var + LN_EPS)
    return y * ln_g + ln_b, H, W


if __name__ == "__main__":
    # Small shapes consistent with the module: img=16, patch=7, stride=4,
    # in_chans=4, embed_dim=32, batch=2.
    B, C, H, W = 2, 4, 16, 16
    patch_size, stride, E = 7, 4, 32

    key = jax.random.PRNGKey(0)
    kx, kw_ = jax.random.split(key)
    x = jax.random.normal(kx, (B, C, H, W), dtype=jnp.float32)

    # Deterministic init mirroring _init_weights:
    # Conv2d: weight ~ N(0, sqrt(2 / fan_out)), fan_out = kh*kw*E, bias = 0
    fan_out = patch_size * patch_size * E
    conv_w = jax.random.normal(kw_, (E, C, patch_size, patch_size),
                               dtype=jnp.float32) * jnp.sqrt(2.0 / fan_out)
    conv_b = jnp.zeros((E,), jnp.float32)
    # LayerNorm: weight = 1, bias = 0
    ln_g = jnp.ones((E,), jnp.float32)
    ln_b = jnp.zeros((E,), jnp.float32)

    out, H_out, W_out = patch_embed(x, conv_w, conv_b, ln_g, ln_b,
                                    patch_size=patch_size, stride=stride)
    out = jax.block_until_ready(out)

    ref, H_ref, W_ref = _reference(x, conv_w, conv_b, ln_g, ln_b, patch_size, stride)
    assert (H_out, W_out) == (H_ref, W_ref)
    assert out.shape == (B, H_out * W_out, E)
    assert jnp.allclose(out, ref, atol=1e-4, rtol=1e-4)

    print("KERNEL_OK")
</pallas_src>

<mosaic_0001>
module attributes {stable_mosaic.version = 11 : i64} {
  func.func @_patch_embed_kernel(%arg0: i32, %arg1: memref<32x196xf32, #tpu.memory_space<vmem>>, %arg2: memref<196x32xf32, #tpu.memory_space<vmem>>, %arg3: memref<3x32xf32, #tpu.memory_space<vmem>>, %arg4: memref<32x32xf32, #tpu.memory_space<vmem>>) attributes {dimension_semantics = [#tpu.dimension_semantics<parallel>], iteration_bounds = array<i64: 1>, scalar_prefetch = 0 : i64, scratch_operands = 0 : i64, tpu.core_type = #tpu.core_type<tc>, window_params = [{transform_indices = @transform_0, window_bounds = array<i64: 32, 196>}, {pipeline_mode = #tpu.pipeline_mode<synchronous>, transform_indices = @transform_1, window_bounds = array<i64: 196, 32>}, {pipeline_mode = #tpu.pipeline_mode<synchronous>, transform_indices = @transform_2, window_bounds = array<i64: 3, 32>}, {transform_indices = @transform_3, window_bounds = array<i64: 32, 32>}]} {
    %c0 = arith.constant 0 : index
    %c0_0 = arith.constant 0 : index
    %0 = vector.load %arg1[%c0, %c0_0] : memref<32x196xf32, #tpu.memory_space<vmem>>, vector<32x196xf32>
    %c0_1 = arith.constant 0 : index
    %c0_2 = arith.constant 0 : index
    %1 = vector.load %arg2[%c0_1, %c0_2] : memref<196x32xf32, #tpu.memory_space<vmem>>, vector<196x32xf32>
    %cst = arith.constant dense<0.000000e+00> : vector<32x32xf32>
    %2 = tpu.matmul %0, %1, %cst {dimension_numbers = #tpu.dot_dimension_numbers<[1], [0], [0], [1], [0, 0, 1, 1], [], []>} : vector<32x196xf32>, vector<196x32xf32>, vector<32x32xf32> -> vector<32x32xf32>
    %c2 = arith.constant 2 : index
    %c0_3 = arith.constant 0 : index
    %3 = vector.load %arg3[%c2, %c0_3] : memref<3x32xf32, #tpu.memory_space<vmem>>, vector<1x32xf32>
    %4 = vector.broadcast %3 : vector<1x32xf32> to vector<32x32xf32>
    %5 = arith.addf %2, %4 : vector<32x32xf32>
    %cst_4 = arith.constant dense<0.000000e+00> : vector<32xf32>
    %6 = vector.multi_reduction <add>, %5, %cst_4 [1] : vector<32x32xf32> to vector<32xf32>
    %7 = vector.shape_cast %6 : vector<32xf32> to vector<32x1xf32>
    %cst_5 = arith.constant 3.125000e-02 : f32
    %8 = vector.broadcast %cst_5 : f32 to vector<32x1xf32>
    %9 = arith.mulf %7, %8 : vector<32x1xf32>
    %10 = vector.broadcast %9 : vector<32x1xf32> to vector<32x32xf32>
    %11 = arith.subf %5, %10 : vector<32x32xf32>
    %12 = arith.mulf %11, %11 : vector<32x32xf32>
    %cst_6 = arith.constant dense<0.000000e+00> : vector<32xf32>
    %13 = vector.multi_reduction <add>, %12, %cst_6 [1] : vector<32x32xf32> to vector<32xf32>
    %14 = vector.shape_cast %13 : vector<32xf32> to vector<32x1xf32>
    %cst_7 = arith.constant 3.125000e-02 : f32
    %15 = vector.broadcast %cst_7 : f32 to vector<32x1xf32>
    %16 = arith.mulf %14, %15 : vector<32x1xf32>
    %cst_8 = arith.constant 9.99999974E-6 : f32
    %17 = vector.broadcast %cst_8 : f32 to vector<32x1xf32>
    %18 = arith.addf %16, %17 : vector<32x1xf32>
    %19 = math.rsqrt %18 : vector<32x1xf32>
    %20 = vector.broadcast %19 : vector<32x1xf32> to vector<32x32xf32>
    %21 = arith.mulf %11, %20 : vector<32x32xf32>
    %c0_9 = arith.constant 0 : index
    %c0_10 = arith.constant 0 : index
    %22 = vector.load %arg3[%c0_9, %c0_10] : memref<3x32xf32, #tpu.memory_space<vmem>>, vector<1x32xf32>
    %23 = vector.broadcast %22 : vector<1x32xf32> to vector<32x32xf32>
    %24 = arith.mulf %21, %23 : vector<32x32xf32>
    %c1 = arith.constant 1 : index
    %c0_11 = arith.constant 0 : index
    %25 = vector.load %arg3[%c1, %c0_11] : memref<3x32xf32, #tpu.memory_space<vmem>>, vector<1x32xf32>
    %26 = vector.broadcast %25 : vector<1x32xf32> to vector<32x32xf32>
    %27 = arith.addf %24, %26 : vector<32x32xf32>
    %c0_12 = arith.constant 0 : index
    %c0_13 = arith.constant 0 : index
    %28 = vector.load %arg4[%c0_12, %c0_13] : memref<32x32xf32, #tpu.memory_space<vmem>>, vector<32x32xf32>
    tpu.vector_store %arg4[%c0_12, %c0_13], %27 {strides = array<i32>} : memref<32x32xf32, #tpu.memory_space<vmem>>, vector<32x32xf32>,
    return
  }
  func.func @transform_0(%arg0: i32) -> (i32, i32) {
    %c0_i32 = arith.constant 0 : i32
    %c0_i32_0 = arith.constant 0 : i32
    return %arg0, %c0_i32 : i32, i32
  }
  func.func @transform_1(%arg0: i32) -> (i32, i32) {
    %c0_i32 = arith.constant 0 : i32
    %c0_i32_0 = arith.constant 0 : i32
    %c0_i32_1 = arith.constant 0 : i32
    return %c0_i32, %c0_i32_0 : i32, i32
  }
  func.func @transform_2(%arg0: i32) -> (i32, i32) {
    %c0_i32 = arith.constant 0 : i32
    %c0_i32_0 = arith.constant 0 : i32
    %c0_i32_1 = arith.constant 0 : i32
    return %c0_i32, %c0_i32_0 : i32, i32
  }
  func.func @transform_3(%arg0: i32) -> (i32, i32) {
    %c0_i32 = arith.constant 0 : i32
    %c0_i32_0 = arith.constant 0 : i32
    return %arg0, %c0_i32 : i32, i32
  }
}

</mosaic_0001>

<bundles_post_ra>
// kernel: patch_embed.1
= control target key start
LH: loop header
LB: loop body
LE: loop exit
PB: predicated region body
PF: predicated region fallthrough
CT: control target
= control target key end

     0   :  { %v353_v3 = vmov 0.0|0.0   ;;  %vm53_vm0 = vcmask 556032   ;;  %s538_s0 = inlined_call_operand.vmem [shape: f32[32,196], index: 0, kind: input, shape index: {}]   ;;  %s539_s1 = inlined_call_operand.vmem [shape: f32[196,32], index: 1, kind: input, shape index: {}]   ;;  %s540_s2 = inlined_call_operand.vmem [shape: f32[3,32], index: 2, kind: input, shape index: {}]   ;;  %s541_s3 = inlined_call_operand.hbm [shape: f32[32,32], index: 3, kind: output, shape index: {}]  }
   0x1   :  { %v23_v0 = vld [vmem:[%s539_s1] sm:$0xff]  ;;  %v24_v1 = vld [vmem:[%s539_s1 + $0x8] sm:$0xff]  ;;  %v25_v2 = vld [vmem:[%s539_s1 + $0x10] sm:$0xff]  ;;  %254 = vmatprep.subr.bf16.mxu0 %v353_v3  ;;  %290 = vmatprep.subr.bf16.mxu1 %v353_v3 }
   0x2   :  { %v255_v4 = vpack.c.bf16 %v24_v1, %v23_v0  ;;  %v26_v5 = vld [vmem:[%s539_s1 + $0x18] sm:$0xff]  ;;  %v27_v7 = vld [vmem:[%s539_s1 + $0x20] sm:$0xff]  ;;  %v28_v8 = vld [vmem:[%s539_s1 + $0x28] sm:$0xff] }
   0x3   :  { %v258_v6 = vpack.c.bf16 %v26_v5, %v25_v2  ;;  %v261_v9 = vpack.c.bf16 %v28_v8, %v27_v7  ;;  %v29_v10 = vld [vmem:[%s539_s1 + $0x30] sm:$0xff]  ;;  %v30_v11 = vld [vmem:[%s539_s1 + $0x38] sm:$0xff]  ;;  %v16_v12 = vld [vmem:[%s538_s0 + $0x8] sm:$0xff] }
   0x4   :  { %256 = vmatpush1.bf16.msra.mxu0 %v255_v4  ;;  %303 = vmatpush1.bf16.msra.mxu1 %v255_v4  ;;  %v20_v13 = vld [vmem:[%s538_s0 + $0x28] sm:$0xff]  ;;  %v264_v14 = vpack.c.bf16 %v30_v11, %v29_v10 }
   0x5   :  { %257 = vmatprep.subr.bf16.mxu0 %v353_v3  ;;  %291 = vmatprep.subr.bf16.mxu1 %v353_v3 }
   0x6   :  { %248 = vmatprep.mubr.msk.f32.mxu0 %vm53_vm0, %v16_v12  ;;  %250 = vmatprep.mubr.msk.f32.mxu1 %vm53_vm0, %v20_v13 }
   0x8   :  { %259 = vmatpush1.bf16.msra.mxu0 %v258_v6  ;;  %304 = vmatpush1.bf16.msra.mxu1 %v258_v6 }
   0x9   :  { %260 = vmatprep.subr.bf16.mxu0 %v353_v3  ;;  %292 = vmatprep.subr.bf16.mxu1 %v353_v3 }
   0xc   :  { %262 = vmatpush1.bf16.msra.mxu0 %v261_v9  ;;  %305 = vmatpush1.bf16.msra.mxu1 %v261_v9 }
   0xd   :  { %8 = vsyncpa [#allocation3], 0  ;;  %263 = vmatprep.subr.bf16.mxu0 %v353_v3  ;;  %293 = vmatprep.subr.bf16.mxu1 %v353_v3  ;;  %v31_v15 = vld [vmem:[%s539_s1 + $0x40] sm:$0xff]  ;;  %v32_v16 = vld [vmem:[%s539_s1 + $0x48] sm:$0xff]  ;;  %v354_v39 = vmov 0.0   ;;  %vm66_vm1 = vcmask 1043456  }
   0xe   :  { %v267_v17 = vpack.c.bf16 %v32_v16, %v31_v15  ;;  %v33_v18 = vld [vmem:[%s539_s1 + $0x50] sm:$0xff]  ;;  %v34_v19 = vld [vmem:[%s539_s1 + $0x58] sm:$0xff]  ;;  %v35_v21 = vld [vmem:[%s539_s1 + $0x60] sm:$0xff]  ;;  %vm155_vm2 = vcmask 261120   ;;  %s355_s28 = smov [#allocation2]  }
   0xf   :  { %v270_v20 = vpack.c.bf16 %v34_v19, %v33_v18  ;;  %v36_v22 = vld [vmem:[%s539_s1 + $0x68] sm:$0xff]  ;;  %v37_v24 = vld [vmem:[%s539_s1 + $0x70] sm:$0xff]  ;;  %v38_v25 = vld [vmem:[%s539_s1 + $0x78] sm:$0xff]  ;;  %s235_s29 = sshll.u32 %s355_s28, 4  ;;  %s236_s29 = int_to_ptr.vmem [resolvable:$true] %s235_s29 }
  0x10   :  { %265 = vmatpush1.bf16.msra.mxu0 %v264_v14  ;;  %306 = vmatpush1.bf16.msra.mxu1 %v264_v14  ;;  %v273_v23 = vpack.c.bf16 %v36_v22, %v35_v21  ;;  %v276_v26 = vpack.c.bf16 %v38_v25, %v37_v24  ;;  %v39_v27 = vld [vmem:[%s539_s1 + $0x80] sm:$0xff]  ;;  %v40_v28 = vld [vmem:[%s539_s1 + $0x88] sm:$0xff]  ;;  %v41_v30 = vld [vmem:[%s539_s1 + $0x90] sm:$0xff]  ;;  %p334_p1 = scmp.lt.s32.totalorder %s236_s29, %s236_s29 }
  0x11   :  { %266 = vmatprep.subr.bf16.mxu0 %v353_v3  ;;  %294 = vmatprep.subr.bf16.mxu1 %v353_v3  ;;  %v279_v29 = vpack.c.bf16 %v40_v28, %v39_v27  ;;  %v42_v31 = vld [vmem:[%s539_s1 + $0x98] sm:$0xff]  ;;  %v43_v33 = vld [vmem:[%s539_s1 + $0xa0] sm:$0xff]  ;;  %v44_v34 = vld [vmem:[%s539_s1 + $0xa8] sm:$0xff] }
  0x12   :  { %v282_v32 = vpack.c.bf16 %v42_v31, %v41_v30  ;;  %v285_v35 = vpack.c.bf16 %v44_v34, %v43_v33  ;;  %v45_v36 = vld [vmem:[%s539_s1 + $0xb0] sm:$0xff]  ;;  %v46_v37 = vld [vmem:[%s539_s1 + $0xb8] sm:$0xff]  ;;  %v47_v40 = vld [vmem:[%s539_s1 + $0xc0] sm:$0xf] }
  0x13   :  { %v288_v38 = vpack.c.bf16 %v46_v37, %v45_v36  ;;  %v15_v41 = vld [vmem:[%s538_s0] sm:$0xff]  ;;  %v18_v43 = vld [vmem:[%s538_s0 + $0x18] sm:$0xff]  ;;  %v17_v45 = vld [vmem:[%s538_s0 + $0x10] sm:$0xff] }
  0x14   :  { %268 = vmatpush1.bf16.msra.mxu0 %v267_v17  ;;  %307 = vmatpush1.bf16.msra.mxu1 %v267_v17  ;;  %v19_v42 = vld [vmem:[%s538_s0 + $0x20] sm:$0xff]  ;;  %v22_v44 = vld [vmem:[%s538_s0 + $0x38] sm:$0xff]  ;;  %v21_v46 = vld [vmem:[%s538_s0 + $0x30] sm:$0xff] }
  0x15   :  { %269 = vmatprep.subr.bf16.mxu0 %v353_v3  ;;  %295 = vmatprep.subr.bf16.mxu1 %v353_v3  ;;  %v246_v47 = vld [vmem:[%s540_s2 + $0x2] ss:$0 sm:$0xff]  ;;  %v252_v33 = vld [vmem:[%s540_s2] ss:$0 sm:$0xff] }
  0x18   :  { %271 = vmatpush1.bf16.msra.mxu0 %v270_v20  ;;  %308 = vmatpush1.bf16.msra.mxu1 %v270_v20 }
  0x19   :  { %272 = vmatprep.subr.bf16.mxu0 %v353_v3  ;;  %296 = vmatprep.subr.bf16.mxu1 %v353_v3 }
  0x1c   :  { %274 = vmatpush1.bf16.msra.mxu0 %v273_v23  ;;  %309 = vmatpush1.bf16.msra.mxu1 %v273_v23 }
  0x1d   :  { %275 = vmatprep.subr.bf16.mxu0 %v353_v3  ;;  %297 = vmatprep.subr.bf16.mxu1 %v353_v3 }
  0x20   :  { %277 = vmatpush1.bf16.msra.mxu0 %v276_v26  ;;  %310 = vmatpush1.bf16.msra.mxu1 %v276_v26 }
  0x21   :  { %278 = vmatprep.subr.bf16.mxu0 %v353_v3  ;;  %298 = vmatprep.subr.bf16.mxu1 %v353_v3 }
  0x24   :  { %280 = vmatpush1.bf16.msra.mxu0 %v279_v29  ;;  %311 = vmatpush1.bf16.msra.mxu1 %v279_v29 }
  0x25   :  { %281 = vmatprep.subr.bf16.mxu0 %v353_v3  ;;  %299 = vmatprep.subr.bf16.mxu1 %v353_v3 }
  0x28   :  { %283 = vmatpush1.bf16.msra.mxu0 %v282_v32  ;;  %312 = vmatpush1.bf16.msra.mxu1 %v282_v32 }
  0x29   :  { %284 = vmatprep.subr.bf16.mxu0 %v353_v3  ;;  %300 = vmatprep.subr.bf16.mxu1 %v353_v3 }
  0x2c   :  { %286 = vmatpush1.bf16.msra.mxu0 %v285_v35  ;;  %313 = vmatpush1.bf16.msra.mxu1 %v285_v35  ;;  %v253_v35 = vld [vmem:[%s540_s2 + $0x1] ss:$0 sm:$0xff]  ;;  %s329_s2 = scalar_lea.vmem %s236_s29, 512 }
  0x2d   :  { %287 = vmatprep.subr.bf16.mxu0 %v353_v3  ;;  %301 = vmatprep.subr.bf16.mxu1 %v353_v3  ;;  %p330_p0 = scmp.ne.s32.totalorder %s236_s29, %s329_s2  ;;  %p335_p2 = scmp.lt.s32.totalorder %s329_s2, %s329_s2 }
  0x2f   :  { %p336_p3 = por %p335_p2, %p334_p1 }
  0x30   :  { %289 = vmatpush1.bf16.msra.mxu0 %v288_v38  ;;  %314 = vmatpush1.bf16.msra.mxu1 %v288_v38 }
  0x31   :  { %118 = vmatprep.subr.mxu0 %v354_v39  ;;  %302 = vmatprep.subr.mxu1 %v354_v39  ;;  %p337_p4 = pnand %p336_p3, %p330_p0 }
  0x34   :  { %247 = vmatpush1.msk.msra.mxu0 %vm66_vm1, %v47_v40  ;;  %315 = vmatpush1.msk.msra.mxu1 %vm66_vm1, %v47_v40 }
  0x35   :  { %135 = vmatmul.mubr.f32.vlgmr.msra.gmra.mrb[0].mxu0 %v15_v41  ;;  %145 = vmatmul.mubr.f32.vlgmr.msra.gmra.mrb[0].mxu1 %v19_v42 }
  0x36   :  { %249 = vmatprep.mubr.msk.f32.mxu0 %vm53_vm0, %v18_v43  ;;  %251 = vmatprep.mubr.msk.f32.mxu1 %vm53_vm0, %v22_v44 }
  0x39   :  { %140 = vmatmul.mubr.f32.gmra.mrb[2].mxu0 %v17_v45  ;;  %150 = vmatmul.mubr.f32.gmra.mrb[2].mxu1 %v21_v46 }
 0x108   :  { %v136_v48 = vpop.f32.mrb[0].mxu0  ;;  %v146_v49 = vpop.f32.mrb[0].mxu1 }
 0x109   :  { %v137_v50 = vadd.f32 %v246_v47, %v136_v48  ;;  %v147_v51 = vadd.f32 %v246_v47, %v146_v49  ;;  %v138_v52 = vpop.f32.mrb[1].mxu0  ;;  %v148_v53 = vpop.f32.mrb[1].mxu1 }
 0x10b   :  { %v162_v54 = vsel %vm155_vm2, %v147_v51, 0.0  ;;  %v156_v55 = vsel %vm155_vm2, %v137_v50, 0.0 }
 0x10c   :  { %v151_v56 = vpop.f32.mrb[2].mxu1  ;;  %163 = vadd.xlane.f32.xlu1 %v162_v54  ;;  %v141_v57 = vpop.f32.mrb[2].mxu0  ;;  %157 = vadd.xlane.f32.xlu0 %v156_v55 }
 0x10d   :  { %v152_v58 = vadd.f32 %v246_v47, %v151_v56  ;;  %v142_v59 = vadd.f32 %v246_v47, %v141_v57  ;;  %v143_v60 = vpop.f32.mrb[3].mxu0  ;;  %v153_v61 = vpop.f32.mrb[3].mxu1 }
 0x10f   :  { %v165_v62 = vsel %vm155_vm2, %v152_v58, 0.0  ;;  %v159_v63 = vsel %vm155_vm2, %v142_v59, 0.0 }
 0x110   :  { %166 = vadd.xlane.f32.xlu1 %v165_v62  ;;  %160 = vadd.xlane.f32.xlu0 %v159_v63 }
 0x199   :  { %v164_v0 = vpop.xlane.xlu1 %163  ;;  %v158_v1 = vpop.xlane.xlu0 %157 }
 0x19a   :  { %v170_v2 = vmul.f32 0.03125, %v164_v0  ;;  %v168_v3 = vmul.f32 0.03125, %v158_v1 }
 0x19c   :  { %v174_v4 = vsub.f32 %v147_v51, %v170_v2  ;;  %v172_v5 = vsub.f32 %v137_v50, %v168_v3 }
 0x19d   :  { %v167_v6 = vpop.xlane.xlu1 %166  ;;  %v161_v7 = vpop.xlane.xlu0 %160 }
 0x19e   :  { %v171_v8 = vmul.f32 0.03125, %v167_v6  ;;  %v169_v9 = vmul.f32 0.03125, %v161_v7  ;;  %v176_v10 = vmul.f32 %v172_v5, %v172_v5  ;;  %v178_v14 = vmul.f32 %v174_v4, %v174_v4 }
 0x1a0   :  { %v175_v11 = vsub.f32 %v152_v58, %v171_v8  ;;  %v173_v12 = vsub.f32 %v142_v59, %v169_v9  ;;  %v180_v13 = vsel %vm155_vm2, %v176_v10, 0.0  ;;  %v186_v16 = vsel %vm155_vm2, %v178_v14, 0.0 }
 0x1a1   :  { %181 = vadd.xlane.f32.xlu0 %v180_v13 }
 0x1a2   :  { %v177_v15 = vmul.f32 %v173_v12, %v173_v12  ;;  %v179_v18 = vmul.f32 %v175_v11, %v175_v11 }
 0x1a4   :  { %v183_v17 = vsel %vm155_vm2, %v177_v15, 0.0  ;;  %v189_v19 = vsel %vm155_vm2, %v179_v18, 0.0 }
 0x1a5   :  { %187 = vadd.xlane.f32.xlu0 %v186_v16  ;;  %184 = vadd.xlane.f32.xlu1 %v183_v17 }
 0x1a9   :  { %190 = vadd.xlane.f32.xlu1 %v189_v19 }
 0x22e   :  { %v182_v20 = vpop.xlane.xlu0 %181 }
 0x22f   :  { %v192_v21 = vmul.f32 0.03125, %v182_v20 }
 0x231   :  { %v196_v22 = vadd.f32 1e-05, %v192_v21 }
 0x232   :  { %v185_v23 = vpop.xlane.xlu1 %184  ;;  %v188_v24 = vpop.xlane.xlu0 %187 }
 0x233   :  { %321 = vrsqrt.f32 %v196_v22  ;;  %v193_v25 = vmul.f32 0.03125, %v185_v23  ;;  %v194_v26 = vmul.f32 0.03125, %v188_v24 }
 0x235   :  { %v197_v27 = vadd.f32 1e-05, %v193_v25  ;;  %v198_v28 = vadd.f32 1e-05, %v194_v26 }
 0x236   :  { %v191_v29 = vpop.xlane.xlu1 %190 }
 0x237   :  { %323 = vrsqrt.f32 %v197_v27  ;;  %v195_v30 = vmul.f32 0.03125, %v191_v29 }
 0x238   :  { %325 = vrsqrt.f32 %v198_v28 }
 0x239   :  { %v199_v31 = vadd.f32 1e-05, %v195_v30 }
 0x23b   :  { %327 = vrsqrt.f32 %v199_v31 }
 0x23d   :  { %v322_v32 = vpop.eup %321 }
 0x23e   :  { %v204_v34 = vmul.f32 %v322_v32, %v172_v5 }
 0x240   :  { %v213_v36 = vmul.f32 %v252_v33, %v204_v34 }
 0x241   :  { %v324_v37 = vpop.eup %323 }
 0x242   :  { %v326_v38 = vpop.eup %325  ;;  %v222_v39 = vadd.f32 %v253_v35, %v213_v36  ;;  %v205_v40 = vmul.f32 %v324_v37, %v173_v12 }
 0x243   :  { %v206_v41 = vmul.f32 %v326_v38, %v174_v4 }
 0x244   :  { %226 = vst.msk [vmem:[#allocation2] sm:$0xff] %vm155_vm2, %v222_v39  ;;  %v214_v42 = vmul.f32 %v252_v33, %v205_v40 }
 0x245   :  { %v328_v43 = vpop.eup %327  ;;  %v215_v44 = vmul.f32 %v252_v33, %v206_v41 }
 0x246   :  { %v223_v45 = vadd.f32 %v253_v35, %v214_v42  ;;  %v207_v46 = vmul.f32 %v328_v43, %v175_v11 }
 0x247   :  { %v224_v47 = vadd.f32 %v253_v35, %v215_v44 }
 0x248   :  { %227 = vst.msk [vmem:[#allocation2 + $0x8] sm:$0xff] %vm155_vm2, %v223_v45  ;;  %v216_v48 = vmul.f32 %v252_v33, %v207_v46 }
 0x249   :  { %228 = vst.msk [vmem:[#allocation2 + $0x10] sm:$0xff] %vm155_vm2, %v224_v47 }
 0x24a   :  { %v225_v49 = vadd.f32 %v253_v35, %v216_v48 }
 0x24c   :  { %229 = vst.msk [vmem:[#allocation2 + $0x18] sm:$0xff] %vm155_vm2, %v225_v49 }
 0x24d   :  { %340 = shalt.err (!%p337_p4)
}
 0x24e   :  { %s341_s5 = scalar_lea.hbm %s541_s3, 512 }
 0x24f   :  { %p342_p5 = scmp.ne.s32.totalorder %s541_s3, %s341_s5  ;;  %p345_p6 = scmp.lt.u32.totalorder %s341_s5, %s541_s3 }
 0x251   :  { %p347_p7 = pnand %p345_p6, %p342_p5 }
 0x253   :  { %350 = shalt.err (!%p347_p7)
}
 0x254   :  { %s356_s10 = smov 128   ;;  %s357_s11 = smov 8  }
 0x255   :  { %241 = dma.vmem_to_hbm [thread:$0]  %s236_s29, 512, %s541_s3, [#allocation3], %s356_s10, %s356_s10, %s357_s11  }
 0x256   :  { %351 = dma.done.wait [#allocation3], 512  }
 0x257   :  { %352 = vsyncadd [#allocation3], 4294966784 }
 0x258   :  { %245 = vsyncpa [#allocation3], 1 }

</bundles_post_ra>
